<compile_context>
chip_gen: v7x
topology: tpu7x:2x2x1
jax: 0.10.0
libtpu: 0.0.40
codegen_flags: <defaults>
</compile_context>

<pallas_src>
import jax
import jax.numpy as jnp
from jax.experimental import pallas as pl
from jax.experimental.pallas import tpu as pltpu


_LANE = 128
_SUBLANE = 8
_SMALL_K_VPU_THRESHOLD = 16  # below this, fc1 skips the MXU


def _round_up(x, m):
    return ((x + m - 1) // m) * m


def actor_kernel(x_ref, w1_ref, b1_ref, w2_ref, b2_ref, w3_ref, b3_ref, o_ref):
    """Fused fc1->ReLU->fc2->ReLU->fc3 on one batch tile.

    x_ref : (TB, nb_states)        compute dtype (bf16 or f32)
    w*_ref: (in, out)              compute dtype
    b*_ref: (1, out)               float32
    o_ref : (TB, n_out_padded)     float32 (lane-dense; padded columns are zero)
    """
    x = x_ref[...]
    nb_states = x_ref.shape[1]

    # ---- fc1 + ReLU ----
    b1 = b1_ref[...].astype(jnp.float32)
    if nb_states <= _SMALL_K_VPU_THRESHOLD:
        # Tiny K: unrolled broadcast-multiply accumulation on the VPU instead of
        # pushing a K=8 contraction through the 128/256-deep MXU.
        xf = x.astype(jnp.float32)
        w1f = w1_ref[...].astype(jnp.float32)
        acc = xf[:, 0:1] * w1f[0:1, :]
        for k in range(1, nb_states):
            acc = acc + xf[:, k:k + 1] * w1f[k:k + 1, :]
        h1 = acc + b1
    else:
        h1 = jnp.dot(x, w1_ref[...], preferred_element_type=jnp.float32) + b1
    h1 = jnp.maximum(h1, 0.0)

    # ---- fc2 + ReLU ----
    h2 = jnp.dot(h1.astype(w2_ref.dtype), w2_ref[...],
                 preferred_element_type=jnp.float32)
    h2 = jnp.maximum(h2 + b2_ref[...].astype(jnp.float32), 0.0)

    # ---- fc3 (no activation; matches PyTorch forward — softplus member is unused) ----
    out = jnp.dot(h2.astype(w3_ref.dtype), w3_ref[...],
                  preferred_element_type=jnp.float32)
    o_ref[...] = (out + b3_ref[...].astype(jnp.float32)).astype(o_ref.dtype)


def actor_forward(x, params, *, block_b=4096, compute_dtype=jnp.bfloat16):
    """x: [B, nb_states]; params: dict of w1,b1,w2,b2,w3,b3 (W as [in, out], b as [1, out])."""
    w1, b1 = params["w1"], params["b1"]
    w2, b2 = params["w2"], params["b2"]
    w3, b3 = params["w3"], params["b3"]

    B, nb_states = x.shape
    hidden1 = w1.shape[1]
    hidden2 = w2.shape[1]
    nb_actions = w3.shape[1]
    out_dtype = x.dtype

    # --- lane-dense output: zero-pad fc3 columns up to a multiple of 128 lanes ---
    n_out = _round_up(max(nb_actions, 1), _LANE)
    if n_out != nb_actions:
        w3 = jnp.pad(w3, ((0, 0), (0, n_out - nb_actions)))
        b3 = jnp.pad(b3, ((0, 0), (0, n_out - nb_actions)))

    # --- batch tile: large for HBM-roofline amortization, sublane-aligned ---
    tb = min(block_b, _round_up(B, _SUBLANE))
    tb = _round_up(tb, _SUBLANE)
    b_pad = _round_up(B, tb)
    if b_pad != B:
        x = jnp.pad(x, ((0, b_pad - B), (0, 0)))

    # --- bf16 MXU inputs; f32 accumulate + f32 bias/ReLU inside the kernel ---
    x = x.astype(compute_dtype)
    w1 = w1.astype(compute_dtype)
    w2 = w2.astype(compute_dtype)
    w3 = w3.astype(compute_dtype)
    b1 = b1.astype(jnp.float32)
    b2 = b2.astype(jnp.float32)
    b3 = b3.astype(jnp.float32)

    grid = (b_pad // tb,)

    def resident(shape):
        # Constant block index -> stays VMEM-resident across grid steps (no re-DMA).
        return pl.BlockSpec(shape, lambda i: (0, 0))

    out = pl.pallas_call(
        actor_kernel,
        out_shape=jax.ShapeDtypeStruct((b_pad, n_out), jnp.float32),
        grid=grid,
        in_specs=[
            pl.BlockSpec((tb, nb_states), lambda i: (i, 0)),   # x: streamed per tile
            resident((nb_states, hidden1)),                    # w1
            resident((1, hidden1)),                            # b1
            resident((hidden1, hidden2)),                      # w2
            resident((1, hidden2)),                            # b2
            resident((hidden2, n_out)),                        # w3 (lane-padded)
            resident((1, n_out)),                              # b3 (lane-padded)
        ],
        out_specs=pl.BlockSpec((tb, n_out), lambda i: (i, 0)),
        compiler_params=pltpu.CompilerParams(
            dimension_semantics=("parallel",),      # shards batch tiles across v7x's 2 TCs
            vmem_limit_bytes=32 * 1024 * 1024,      # explicit, safe on v5e/v6e/v7x
        ),
    )(x, w1, b1, w2, b2, w3, b3)

    return out[:B, :nb_actions].astype(out_dtype)


def init_params(key, nb_states, nb_actions, hidden1=64, hidden2=64):
    """Deterministic synthetic init (PyTorch-default-like uniform bounds)."""
    ks = jax.random.split(key, 6)

    def lin(kw, kb, fan_in, fan_out):
        bound = 1.0 / (fan_in ** 0.5)
        w = jax.random.uniform(kw, (fan_in, fan_out), jnp.float32, -bound, bound)
        b = jax.random.uniform(kb, (1, fan_out), jnp.float32, -bound, bound)
        return w, b

    w1, b1 = lin(ks[0], ks[1], nb_states, hidden1)
    w2, b2 = lin(ks[2], ks[3], hidden1, hidden2)
    w3, b3 = lin(ks[4], ks[5], hidden2, nb_actions)
    return {"w1": w1, "b1": b1, "w2": w2, "b2": b2, "w3": w3, "b3": b3}


def reference_forward(x, p):
    h1 = jnp.maximum(x @ p["w1"] + p["b1"], 0.0)
    h2 = jnp.maximum(h1 @ p["w2"] + p["b2"], 0.0)
    return h2 @ p["w3"] + p["b3"]


if __name__ == "__main__":
    key = jax.random.PRNGKey(0)
    k_x, k_p, k_x2 = jax.random.split(key, 3)

    B, nb_states, nb_actions, hidden1, hidden2 = 2, 8, 4, 64, 64
    x = jax.random.normal(k_x, (B, nb_states), jnp.float32)
    params = init_params(k_p, nb_states, nb_actions, hidden1, hidden2)

    out = actor_forward(x, params)
    jax.block_until_ready(out)
    ref = reference_forward(x, params)
    assert out.shape == (B, nb_actions)
    # bf16 MXU inputs -> relaxed tolerance vs the f32 reference.
    assert jnp.allclose(out, ref, atol=5e-2, rtol=5e-2), float(jnp.max(jnp.abs(out - ref)))

    # Exercise the multi-step grid + batch-padding path (partial last tile).
    B2 = 200
    x2 = jax.random.normal(k_x2, (B2, nb_states), jnp.float32)
    out2 = actor_forward(x2, params, block_b=64)
    jax.block_until_ready(out2)
    ref2 = reference_forward(x2, params)
    assert out2.shape == (B2, nb_actions)
    assert jnp.allclose(out2, ref2, atol=5e-2, rtol=5e-2)

    print("KERNEL_OK")
</pallas_src>

<mosaic_0001>
module attributes {stable_mosaic.version = 11 : i64} {
  func.func @actor_kernel(%arg0: i32, %arg1: memref<8x8xbf16, #tpu.memory_space<vmem>>, %arg2: memref<8x64xbf16, #tpu.memory_space<vmem>>, %arg3: memref<1x64xf32, #tpu.memory_space<vmem>>, %arg4: memref<64x64xbf16, #tpu.memory_space<vmem>>, %arg5: memref<1x64xf32, #tpu.memory_space<vmem>>, %arg6: memref<64x128xbf16, #tpu.memory_space<vmem>>, %arg7: memref<1x128xf32, #tpu.memory_space<vmem>>, %arg8: memref<8x128xf32, #tpu.memory_space<vmem>>) attributes {dimension_semantics = [#tpu.dimension_semantics<parallel>], iteration_bounds = array<i64: 1>, scalar_prefetch = 0 : i64, scratch_operands = 0 : i64, tpu.core_type = #tpu.core_type<tc>, window_params = [{transform_indices = @transform_0, window_bounds = array<i64: 8, 8>}, {pipeline_mode = #tpu.pipeline_mode<synchronous>, transform_indices = @transform_1, window_bounds = array<i64: 8, 64>}, {pipeline_mode = #tpu.pipeline_mode<synchronous>, transform_indices = @transform_2, window_bounds = array<i64: 1, 64>}, {pipeline_mode = #tpu.pipeline_mode<synchronous>, transform_indices = @transform_3, window_bounds = array<i64: 64, 64>}, {pipeline_mode = #tpu.pipeline_mode<synchronous>, transform_indices = @transform_4, window_bounds = array<i64: 1, 64>}, {pipeline_mode = #tpu.pipeline_mode<synchronous>, transform_indices = @transform_5, window_bounds = array<i64: 64, 128>}, {pipeline_mode = #tpu.pipeline_mode<synchronous>, transform_indices = @transform_6, window_bounds = array<i64: 1, 128>}, {transform_indices = @transform_7, window_bounds = array<i64: 8, 128>}]} {
    %c0 = arith.constant 0 : index
    %c0_0 = arith.constant 0 : index
    %0 = vector.load %arg1[%c0, %c0_0] : memref<8x8xbf16, #tpu.memory_space<vmem>>, vector<8x8xbf16>
    %c0_1 = arith.constant 0 : index
    %c0_2 = arith.constant 0 : index
    %1 = vector.load %arg3[%c0_1, %c0_2] : memref<1x64xf32, #tpu.memory_space<vmem>>, vector<1x64xf32>
    %2 = arith.extf %0 : vector<8x8xbf16> to vector<8x8xf32>
    %c0_3 = arith.constant 0 : index
    %c0_4 = arith.constant 0 : index
    %3 = vector.load %arg2[%c0_3, %c0_4] : memref<8x64xbf16, #tpu.memory_space<vmem>>, vector<8x64xbf16>
    %4 = arith.extf %3 : vector<8x64xbf16> to vector<8x64xf32>
    %5 = vector.extract_strided_slice %2 {offsets = [0, 0], sizes = [8, 1], strides = [1, 1]} : vector<8x8xf32> to vector<8x1xf32>
    %6 = vector.extract_strided_slice %4 {offsets = [0, 0], sizes = [1, 64], strides = [1, 1]} : vector<8x64xf32> to vector<1x64xf32>
    %7 = vector.broadcast %5 : vector<8x1xf32> to vector<8x64xf32>
    %8 = vector.broadcast %6 : vector<1x64xf32> to vector<8x64xf32>
    %9 = arith.mulf %7, %8 : vector<8x64xf32>
    %10 = vector.extract_strided_slice %2 {offsets = [0, 1], sizes = [8, 1], strides = [1, 1]} : vector<8x8xf32> to vector<8x1xf32>
    %11 = vector.extract_strided_slice %4 {offsets = [1, 0], sizes = [1, 64], strides = [1, 1]} : vector<8x64xf32> to vector<1x64xf32>
    %12 = vector.broadcast %10 : vector<8x1xf32> to vector<8x64xf32>
    %13 = vector.broadcast %11 : vector<1x64xf32> to vector<8x64xf32>
    %14 = arith.mulf %12, %13 : vector<8x64xf32>
    %15 = arith.addf %9, %14 : vector<8x64xf32>
    %16 = vector.extract_strided_slice %2 {offsets = [0, 2], sizes = [8, 1], strides = [1, 1]} : vector<8x8xf32> to vector<8x1xf32>
    %17 = vector.extract_strided_slice %4 {offsets = [2, 0], sizes = [1, 64], strides = [1, 1]} : vector<8x64xf32> to vector<1x64xf32>
    %18 = vector.broadcast %16 : vector<8x1xf32> to vector<8x64xf32>
    %19 = vector.broadcast %17 : vector<1x64xf32> to vector<8x64xf32>
    %20 = arith.mulf %18, %19 : vector<8x64xf32>
    %21 = arith.addf %15, %20 : vector<8x64xf32>
    %22 = vector.extract_strided_slice %2 {offsets = [0, 3], sizes = [8, 1], strides = [1, 1]} : vector<8x8xf32> to vector<8x1xf32>
    %23 = vector.extract_strided_slice %4 {offsets = [3, 0], sizes = [1, 64], strides = [1, 1]} : vector<8x64xf32> to vector<1x64xf32>
    %24 = vector.broadcast %22 : vector<8x1xf32> to vector<8x64xf32>
    %25 = vector.broadcast %23 : vector<1x64xf32> to vector<8x64xf32>
    %26 = arith.mulf %24, %25 : vector<8x64xf32>
    %27 = arith.addf %21, %26 : vector<8x64xf32>
    %28 = vector.extract_strided_slice %2 {offsets = [0, 4], sizes = [8, 1], strides = [1, 1]} : vector<8x8xf32> to vector<8x1xf32>
    %29 = vector.extract_strided_slice %4 {offsets = [4, 0], sizes = [1, 64], strides = [1, 1]} : vector<8x64xf32> to vector<1x64xf32>
    %30 = vector.broadcast %28 : vector<8x1xf32> to vector<8x64xf32>
    %31 = vector.broadcast %29 : vector<1x64xf32> to vector<8x64xf32>
    %32 = arith.mulf %30, %31 : vector<8x64xf32>
    %33 = arith.addf %27, %32 : vector<8x64xf32>
    %34 = vector.extract_strided_slice %2 {offsets = [0, 5], sizes = [8, 1], strides = [1, 1]} : vector<8x8xf32> to vector<8x1xf32>
    %35 = vector.extract_strided_slice %4 {offsets = [5, 0], sizes = [1, 64], strides = [1, 1]} : vector<8x64xf32> to vector<1x64xf32>
    %36 = vector.broadcast %34 : vector<8x1xf32> to vector<8x64xf32>
    %37 = vector.broadcast %35 : vector<1x64xf32> to vector<8x64xf32>
    %38 = arith.mulf %36, %37 : vector<8x64xf32>
    %39 = arith.addf %33, %38 : vector<8x64xf32>
    %40 = vector.extract_strided_slice %2 {offsets = [0, 6], sizes = [8, 1], strides = [1, 1]} : vector<8x8xf32> to vector<8x1xf32>
    %41 = vector.extract_strided_slice %4 {offsets = [6, 0], sizes = [1, 64], strides = [1, 1]} : vector<8x64xf32> to vector<1x64xf32>
    %42 = vector.broadcast %40 : vector<8x1xf32> to vector<8x64xf32>
    %43 = vector.broadcast %41 : vector<1x64xf32> to vector<8x64xf32>
    %44 = arith.mulf %42, %43 : vector<8x64xf32>
    %45 = arith.addf %39, %44 : vector<8x64xf32>
    %46 = vector.extract_strided_slice %2 {offsets = [0, 7], sizes = [8, 1], strides = [1, 1]} : vector<8x8xf32> to vector<8x1xf32>
    %47 = vector.extract_strided_slice %4 {offsets = [7, 0], sizes = [1, 64], strides = [1, 1]} : vector<8x64xf32> to vector<1x64xf32>
    %48 = vector.broadcast %46 : vector<8x1xf32> to vector<8x64xf32>
    %49 = vector.broadcast %47 : vector<1x64xf32> to vector<8x64xf32>
    %50 = arith.mulf %48, %49 : vector<8x64xf32>
    %51 = arith.addf %45, %50 : vector<8x64xf32>
    %52 = vector.broadcast %1 : vector<1x64xf32> to vector<8x64xf32>
    %53 = arith.addf %51, %52 : vector<8x64xf32>
    %cst = arith.constant 0.000000e+00 : f32
    %54 = vector.broadcast %cst : f32 to vector<8x64xf32>
    %55 = arith.maximumf %53, %54 : vector<8x64xf32>
    %56 = arith.truncf %55 : vector<8x64xf32> to vector<8x64xbf16>
    %c0_5 = arith.constant 0 : index
    %c0_6 = arith.constant 0 : index
    %57 = vector.load %arg4[%c0_5, %c0_6] : memref<64x64xbf16, #tpu.memory_space<vmem>>, vector<64x64xbf16>
    %cst_7 = arith.constant dense<0.000000e+00> : vector<8x64xf32>
    %58 = tpu.matmul %56, %57, %cst_7 {dimension_numbers = #tpu.dot_dimension_numbers<[1], [0], [0], [1], [0, 0, 1, 1], [], []>} : vector<8x64xbf16>, vector<64x64xbf16>, vector<8x64xf32> -> vector<8x64xf32>
    %c0_8 = arith.constant 0 : index
    %c0_9 = arith.constant 0 : index
    %59 = vector.load %arg5[%c0_8, %c0_9] : memref<1x64xf32, #tpu.memory_space<vmem>>, vector<1x64xf32>
    %60 = vector.broadcast %59 : vector<1x64xf32> to vector<8x64xf32>
    %61 = arith.addf %58, %60 : vector<8x64xf32>
    %cst_10 = arith.constant 0.000000e+00 : f32
    %62 = vector.broadcast %cst_10 : f32 to vector<8x64xf32>
    %63 = arith.maximumf %61, %62 : vector<8x64xf32>
    %64 = arith.truncf %63 : vector<8x64xf32> to vector<8x64xbf16>
    %c0_11 = arith.constant 0 : index
    %c0_12 = arith.constant 0 : index
    %65 = vector.load %arg6[%c0_11, %c0_12] : memref<64x128xbf16, #tpu.memory_space<vmem>>, vector<64x128xbf16>
    %cst_13 = arith.constant dense<0.000000e+00> : vector<8x128xf32>
    %66 = tpu.matmul %64, %65, %cst_13 {dimension_numbers = #tpu.dot_dimension_numbers<[1], [0], [0], [1], [0, 0, 1, 1], [], []>} : vector<8x64xbf16>, vector<64x128xbf16>, vector<8x128xf32> -> vector<8x128xf32>
    %c0_14 = arith.constant 0 : index
    %c0_15 = arith.constant 0 : index
    %67 = vector.load %arg7[%c0_14, %c0_15] : memref<1x128xf32, #tpu.memory_space<vmem>>, vector<1x128xf32>
    %68 = vector.broadcast %67 : vector<1x128xf32> to vector<8x128xf32>
    %69 = arith.addf %66, %68 : vector<8x128xf32>
    %c0_16 = arith.constant 0 : index
    %c0_17 = arith.constant 0 : index
    %70 = vector.load %arg8[%c0_16, %c0_17] : memref<8x128xf32, #tpu.memory_space<vmem>>, vector<8x128xf32>
    tpu.vector_store %arg8[%c0_16, %c0_17], %69 {strides = array<i32>} : memref<8x128xf32, #tpu.memory_space<vmem>>, vector<8x128xf32>,
    return
  }
  func.func @transform_0(%arg0: i32) -> (i32, i32) {
    %c0_i32 = arith.constant 0 : i32
    %c0_i32_0 = arith.constant 0 : i32
    return %arg0, %c0_i32 : i32, i32
  }
  func.func @transform_1(%arg0: i32) -> (i32, i32) {
    %c0_i32 = arith.constant 0 : i32
    %c0_i32_0 = arith.constant 0 : i32
    %c0_i32_1 = arith.constant 0 : i32
    return %c0_i32, %c0_i32_0 : i32, i32
  }
  func.func @transform_2(%arg0: i32) -> (i32, i32) {
    %c0_i32 = arith.constant 0 : i32
    %c0_i32_0 = arith.constant 0 : i32
    %c0_i32_1 = arith.constant 0 : i32
    return %c0_i32, %c0_i32_0 : i32, i32
  }
  func.func @transform_3(%arg0: i32) -> (i32, i32) {
    %c0_i32 = arith.constant 0 : i32
    %c0_i32_0 = arith.constant 0 : i32
    %c0_i32_1 = arith.constant 0 : i32
    return %c0_i32, %c0_i32_0 : i32, i32
  }
  func.func @transform_4(%arg0: i32) -> (i32, i32) {
    %c0_i32 = arith.constant 0 : i32
    %c0_i32_0 = arith.constant 0 : i32
    %c0_i32_1 = arith.constant 0 : i32
    return %c0_i32, %c0_i32_0 : i32, i32
  }
  func.func @transform_5(%arg0: i32) -> (i32, i32) {
    %c0_i32 = arith.constant 0 : i32
    %c0_i32_0 = arith.constant 0 : i32
    %c0_i32_1 = arith.constant 0 : i32
    return %c0_i32, %c0_i32_0 : i32, i32
  }
  func.func @transform_6(%arg0: i32) -> (i32, i32) {
    %c0_i32 = arith.constant 0 : i32
    %c0_i32_0 = arith.constant 0 : i32
    %c0_i32_1 = arith.constant 0 : i32
    return %c0_i32, %c0_i32_0 : i32, i32
  }
  func.func @transform_7(%arg0: i32) -> (i32, i32) {
    %c0_i32 = arith.constant 0 : i32
    %c0_i32_0 = arith.constant 0 : i32
    return %arg0, %c0_i32 : i32, i32
  }
}

</mosaic_0001>

<bundles_post_ra>
// kernel: tpu_custom_call.1
= control target key start
LH: loop header
LB: loop body
LE: loop exit
PB: predicated region body
PF: predicated region fallthrough
CT: control target
= control target key end

     0   :  { %12 = vsyncpa [#allocation3], 0  ;;  %s695_s0 = inlined_call_operand.hbm [shape: bf16[8,8], index: 0, kind: input, shape index: {}]   ;;  %s696_s1 = inlined_call_operand.hbm [shape: bf16[8,64], index: 1, kind: input, shape index: {}]   ;;  %s697_s2 = inlined_call_operand.vmem [shape: f32[1,64], index: 2, kind: input, shape index: {}]   ;;  %s698_s3 = inlined_call_operand.hbm [shape: bf16[64,64], index: 3, kind: input, shape index: {}]   ;;  %s699_s4 = inlined_call_operand.vmem [shape: f32[1,64], index: 4, kind: input, shape index: {}]   ;;  %s700_s5 = inlined_call_operand.hbm [shape: bf16[64,128], index: 5, kind: input, shape index: {}]   ;;  %s701_s6 = inlined_call_operand.vmem [shape: f32[1,128], index: 6, kind: input, shape index: {}]   ;;  %s702_s7 = inlined_call_operand.hbm [shape: f32[8,128], index: 7, kind: output, shape index: {}]  }
   0x1   :  { %13 = vsyncpa [#allocation6], 0 }
   0x2   :  { %14 = vsyncpa [#allocation9], 0 }
   0x3   :  { %15 = vsyncpa [#allocation4], 0  ;;  %s557_s24 = smov [#allocation5]   ;;  %s558_s26 = smov [#allocation2]  }
   0x4   :  { %s32_s25 = sshll.u32 %s557_s24, 4  ;;  %s22_s27 = sshll.u32 %s558_s26, 4  ;;  %s33_s25 = int_to_ptr.vmem [resolvable:$true] %s32_s25  ;;  %s23_s27 = int_to_ptr.vmem [resolvable:$true] %s22_s27 }
   0x5   :  { %s439_s30 = scalar_lea.hbm %s696_s1, 64 }
   0x6   :  { %p440_p0 = scmp.ne.s32.totalorder %s696_s1, %s439_s30  ;;  %p443_p1 = scmp.lt.u32.totalorder %s439_s30, %s696_s1 }
   0x8   :  { %p445_p2 = pnand %p443_p1, %p440_p0 }
   0xa   :  { %448 = shalt.err (!%p445_p2)
}
   0xb   :  { %s449_s12 = scalar_lea.vmem %s33_s25, 64  ;;  %p454_p4 = scmp.lt.s32.totalorder %s33_s25, %s33_s25 }
   0xc   :  { %p450_p3 = scmp.ne.s32.totalorder %s33_s25, %s449_s12  ;;  %p455_p5 = scmp.lt.s32.totalorder %s449_s12, %s449_s12 }
   0xe   :  { %p456_p6 = por %p455_p5, %p454_p4 }
  0x10   :  { %p457_p7 = pnand %p456_p6, %p450_p3 }
  0x12   :  { %460 = shalt.err (!%p457_p7)
}
  0x13   :  { %35 = dma.hbm_to_vmem [thread:$0]  %s696_s1, 64, %s33_s25, [#allocation6]  }
  0x14   :  { %s461_s17 = scalar_lea.hbm %s695_s0, 64 }
  0x15   :  { %p462_p8 = scmp.ne.s32.totalorder %s695_s0, %s461_s17  ;;  %p465_p9 = scmp.lt.u32.totalorder %s461_s17, %s695_s0 }
  0x17   :  { %p467_p10 = pnand %p465_p9, %p462_p8 }
  0x19   :  { %470 = shalt.err (!%p467_p10)
}
  0x1a   :  { %s471_s22 = scalar_lea.vmem %s23_s27, 64  ;;  %p476_p12 = scmp.lt.s32.totalorder %s23_s27, %s23_s27 }
  0x1b   :  { %p472_p11 = scmp.ne.s32.totalorder %s23_s27, %s471_s22  ;;  %p477_p13 = scmp.lt.s32.totalorder %s471_s22, %s471_s22 }
  0x1d   :  { %p478_p0 = por %p477_p13, %p476_p12 }
  0x1f   :  { %p479_p1 = pnand %p478_p0, %p472_p11 }
  0x21   :  { %482 = shalt.err (!%p479_p1)
}
  0x22   :  { %25 = dma.hbm_to_vmem [thread:$0]  %s695_s0, 64, %s23_s27, [#allocation3]  }
  0x23   :  { %s559_s24 = smov [#allocation7]   ;;  %s483_s29 = scalar_lea.hbm %s698_s3, 512 }
  0x24   :  { %s43_s25 = sshll.u32 %s559_s24, 4  ;;  %p484_p2 = scmp.ne.s32.totalorder %s698_s3, %s483_s29  ;;  %s44_s25 = int_to_ptr.vmem [resolvable:$true] %s43_s25 }
  0x25   :  { %p487_p3 = scmp.lt.u32.totalorder %s483_s29, %s698_s3 }
  0x27   :  { %p489_p4 = pnand %p487_p3, %p484_p2 }
  0x29   :  { %492 = shalt.err (!%p489_p4)
}
  0x2a   :  { %s493_s11 = scalar_lea.vmem %s44_s25, 512  ;;  %p498_p6 = scmp.lt.s32.totalorder %s44_s25, %s44_s25 }
  0x2b   :  { %p494_p5 = scmp.ne.s32.totalorder %s44_s25, %s493_s11  ;;  %p499_p7 = scmp.lt.s32.totalorder %s493_s11, %s493_s11 }
  0x2d   :  { %p500_p8 = por %p499_p7, %p498_p6 }
  0x2f   :  { %p501_p9 = pnand %p500_p8, %p494_p5 }
  0x31   :  { %504 = shalt.err (!%p501_p9)
}
  0x32   :  { %s560_s0 = smov 64   ;;  %s561_s27 = smov 4  }
  0x33   :  { %49 = dma.hbm_to_vmem [thread:$0]  %s698_s3, 512, %s44_s25, [#allocation6], %s560_s0, %s560_s0, %s561_s27  }
  0x34   :  { %s562_s14 = smov [#allocation8]   ;;  %s505_s18 = scalar_lea.hbm %s700_s5, 512 }
  0x35   :  { %s57_s15 = sshll.u32 %s562_s14, 4  ;;  %p506_p10 = scmp.ne.s32.totalorder %s700_s5, %s505_s18  ;;  %s58_s15 = int_to_ptr.vmem [resolvable:$true] %s57_s15 }
  0x36   :  { %p509_p11 = scmp.lt.u32.totalorder %s505_s18, %s700_s5 }
  0x38   :  { %p511_p12 = pnand %p509_p11, %p506_p10 }
  0x3a   :  { %514 = shalt.err (!%p511_p12)
}
  0x3b   :  { %s515_s1 = scalar_lea.vmem %s58_s15, 512  ;;  %p520_p0 = scmp.lt.s32.totalorder %s58_s15, %s58_s15 }
  0x3c   :  { %p516_p13 = scmp.ne.s32.totalorder %s58_s15, %s515_s1  ;;  %p521_p1 = scmp.lt.s32.totalorder %s515_s1, %s515_s1 }
  0x3e   :  { %p522_p2 = por %p521_p1, %p520_p0 }
  0x40   :  { %p523_p3 = pnand %p522_p2, %p516_p13 }
  0x42   :  { %526 = shalt.err (!%p523_p3)
}
  0x43   :  { %63 = dma.hbm_to_vmem [thread:$0]  %s700_s5, 512, %s58_s15, [#allocation9], %s560_s0, %s560_s0, %s561_s27  }
  0x44   :  { %549 = dma.done.wait [#allocation3], 64  }
  0x45   :  { %550 = vsyncadd [#allocation3], 4294967232 }
  0x46   :  { %551 = dma.done.wait [#allocation6], 576  }
  0x47   :  { %552 = vsyncadd [#allocation6], 4294966720 }
  0x48   :  { %553 = dma.done.wait [#allocation9], 512  }
  0x49   :  { %554 = vsyncadd [#allocation9], 4294966784  ;;  %v563_v0 = vmov 2   ;;  %v564_v1 = vmov 0   ;;  %v79_v2 = vld [vmem:[#allocation2] sm:$0xf]  ;;  %v89_v17 = vlaneseq }
  0x4a   :  { %424 = vset.pattern.permute.xlu1 %v563_v0  ;;  %422 = vset.pattern.permute.xlu0 %v564_v1  ;;  %v81_v3 = vunpack.c.l.bf16 %v79_v2  ;;  %v565_v4 = vmov 3   ;;  %v566_v5 = vmov 1   ;;  %v567_v6 = vmov 4   ;;  %v431_v8 = vld [vmem:[#allocation7] sm:$0xff]   ;;  %v432_v11 = vld [vmem:[#allocation7 + $0x8] sm:$0xff]   ;;  %v433_v13 = vld [vmem:[#allocation7 + $0x10] sm:$0xff]  }
  0x4b   :  { %v568_v7 = vmov 5   ;;  %v569_v9 = vmov 6   ;;  %v570_v10 = vmov 0.0   ;;  %v571_v12 = vmov 7   ;;  %v434_v14 = vld [vmem:[#allocation7 + $0x18] sm:$0xff]   ;;  %v435_v15 = vld [vmem:[#allocation8] sm:$0xff]  }
  0x4c   :  { %105 = vperm.xlu1 %424, %v81_v3   ;;  %86 = vperm.xlu0 %422, %v81_v3   ;;  %vm572_vm0 = vmmov 0   ;;  %v436_v16 = vld [vmem:[#allocation8 + $0x8] sm:$0xff]   ;;  %v90_v18 = vshrl.u32 %v89_v17, 7  ;;  %v82_v19 = vld [vmem:[#allocation5] sm:$0xf]  ;;  %vm212_vm1 = vcmask 523264  }
  0x4d   :  { %381 = vmatprep.subr.bf16.mxu0 %v570_v10  ;;  %393 = vmatprep.subr.bf16.mxu1 %v570_v10  ;;  %v83_v22 = vunpack.c.l.bf16 %v82_v19  ;;  %v358_v59 = vld [vmem:[%s697_s2] ss:$0 sm:$0xff]  ;;  %v437_v0 = vld [vmem:[#allocation8 + $0x10] sm:$0xff]   ;;  %s573_s29 = smov [#allocation10]  }
  0x4e   :  { %382 = vmatpush3.bf16.msra.mxu0 %v431_v8  ;;  %389 = vmatprep.mubr.msk.bf16.mxu0 %vm572_vm0, %v570_v10  ;;  %v91_v20 = vsub.s32 0, %v90_v18  ;;  %v100_v21 = vsub.s32 1, %v90_v18  ;;  %v110_v23 = vsub.s32 2, %v90_v18  ;;  %v120_v27 = vsub.s32 3, %v90_v18  ;;  %v438_v1 = vld [vmem:[#allocation8 + $0x18] sm:$0xff]   ;;  %s347_s30 = sshll.u32 %s573_s29, 4  ;;  %s348_s30 = int_to_ptr.vmem [resolvable:$true] %s347_s30 }
  0x4f   :  { %383 = vmatprep.subr.bf16.mxu0 %v570_v10  ;;  %401 = vmatprep.mubr.msk.bf16.mxu1 %vm572_vm0, %v570_v10  ;;  %v130_v29 = vsub.s32 4, %v90_v18  ;;  %v140_v33 = vsub.s32 5, %v90_v18  ;;  %v150_v41 = vsub.s32 6, %v90_v18  ;;  %v160_v50 = vsub.s32 7, %v90_v18  ;;  %v359_v2 = vld [vmem:[%s699_s4] ss:$0 sm:$0xff]  ;;  %p532_p5 = scmp.lt.s32.totalorder %s348_s30, %s348_s30 }
  0x50   :  { %425 = vset.pattern.permute.xlu1 %v565_v4  ;;  %423 = vset.pattern.permute.xlu0 %v566_v5  ;;  %v92_v26 = vrot.slane %v83_v22, %v91_v20  ;;  %v101_v28 = vrot.slane %v83_v22, %v100_v21  ;;  %v111_v30 = vrot.slane %v83_v22, %v110_v23  ;;  %s527_s4 = scalar_lea.vmem %s348_s30, 128 }
  0x51   :  { %115 = vperm.xlu1 %425, %v81_v3   ;;  %95 = vperm.xlu0 %423, %v81_v3   ;;  %v121_v35 = vrot.slane %v83_v22, %v120_v27  ;;  %v131_v37 = vrot.slane %v83_v22, %v130_v29  ;;  %v141_v40 = vrot.slane %v83_v22, %v140_v33  ;;  %p528_p4 = scmp.ne.s32.totalorder %s348_s30, %s527_s4  ;;  %p533_p6 = scmp.lt.s32.totalorder %s527_s4, %s527_s4 }
  0x52   :  { %384 = vmatpush3.bf16.msra.mxu0 %v432_v11  ;;  %394 = vmatpush3.bf16.msra.mxu1 %v435_v15  ;;  %v151_v49 = vrot.slane %v83_v22, %v150_v41  ;;  %v161_v55 = vrot.slane %v83_v22, %v160_v50  ;;  %v365_v11 = vld [vmem:[%s701_s6] ss:$0 sm:$0xff] }
  0x53   :  { %385 = vmatprep.subr.bf16.mxu0 %v570_v10  ;;  %395 = vmatprep.subr.bf16.mxu1 %v570_v10  ;;  %p534_p7 = por %p533_p6, %p532_p5 }
  0x55   :  { %426 = vset.pattern.permute.xlu1 %v567_v6  ;;  %427 = vset.pattern.permute.xlu0 %v568_v7  ;;  %p535_p8 = pnand %p534_p7, %p528_p4 }
  0x56   :  { %125 = vperm.xlu1 %426, %v81_v3   ;;  %135 = vperm.xlu0 %427, %v81_v3  }
  0x57   :  { %386 = vmatpush3.bf16.msra.mxu0 %v433_v13  ;;  %396 = vmatpush3.bf16.msra.mxu1 %v436_v16 }
  0x58   :  { %387 = vmatprep.subr.bf16.mxu0 %v570_v10  ;;  %397 = vmatprep.subr.bf16.mxu1 %v570_v10 }
  0x5a   :  { %428 = vset.pattern.permute.xlu1 %v569_v9  ;;  %430 = vset.pattern.permute.xlu0 %v571_v12 }
  0x5b   :  { %145 = vperm.xlu1 %428, %v81_v3   ;;  %388 = vmatpush3.bf16.msra.mxu0 %v434_v14 }
  0x5c   :  { %398 = vmatpush3.bf16.msra.mxu1 %v437_v0 }
  0x5d   :  { %399 = vmatprep.subr.bf16.mxu1 %v570_v10 }
  0x5f   :  { %429 = vset.pattern.permute.xlu1 %v571_v12 }
  0x60   :  { %155 = vperm.xlu1 %429, %v81_v3   ;;  %400 = vmatpush3.bf16.msra.mxu1 %v438_v1 }
  0xcb   :  { %v106_v24 = vpop.permute.xlu1 %105  ;;  %v87_v25 = vpop.permute.xlu0 %86 }
  0xcc   :  { %v93_v34 = vmul.f32 %v92_v26, %v87_v25  ;;  %v112_v38 = vmul.f32 %v111_v30, %v106_v24 }
  0xd0   :  { %v116_v31 = vpop.permute.xlu1 %115  ;;  %v96_v32 = vpop.permute.xlu0 %95 }
  0xd1   :  { %v102_v36 = vmul.f32 %v101_v28, %v96_v32  ;;  %v122_v42 = vmul.f32 %v121_v35, %v116_v31 }
  0xd3   :  { %v103_v39 = vadd.f32 %v102_v36, %v93_v34 }
  0xd5   :  { %v113_v43 = vadd.f32 %v112_v38, %v103_v39  ;;  %v126_v44 = vpop.permute.xlu1 %125  ;;  %v136_v45 = vpop.permute.xlu0 %135 }
  0xd6   :  { %v132_v46 = vmul.f32 %v131_v37, %v126_v44  ;;  %v142_v48 = vmul.f32 %v141_v40, %v136_v45 }
  0xd7   :  { %v123_v47 = vadd.f32 %v122_v42, %v113_v43 }
  0xd9   :  { %v133_v51 = vadd.f32 %v132_v46, %v123_v47 }
  0xda   :  { %v146_v52 = vpop.permute.xlu1 %145 }
  0xdb   :  { %v143_v53 = vadd.f32 %v142_v48, %v133_v51  ;;  %v152_v54 = vmul.f32 %v151_v49, %v146_v52 }
  0xdd   :  { %v153_v57 = vadd.f32 %v152_v54, %v143_v53 }
  0xdf   :  { %v156_v56 = vpop.permute.xlu1 %155 }
  0xe0   :  { %v162_v58 = vmul.f32 %v161_v55, %v156_v56 }
  0xe2   :  { %v163_v60 = vadd.f32 %v162_v58, %v153_v57 }
  0xe4   :  { %v170_v61 = vadd.f32 %v358_v59, %v163_v60 }
  0xe6   :  { %v171_v62 = vmax.f32 %v170_v61, 0.0 }
  0xe8   :  { %v172_v63 = vpack.c.bf16 %v171_v62, %v171_v62 }
  0xea   :  { %390 = vmatmul.mubr.msk.bf16.vlgmr.msra.gmra.mrb[0].mxu0 %vm212_vm1, %v172_v63 }
 0x1bd   :  { %v250_v3 = vpop.f32.mrb[0].mxu0 }
 0x1be   :  { %v251_v4 = vadd.f32 %v359_v2, %v250_v3  ;;  %v391_v5 = vpop.f32.mrb[1].mxu0 }
 0x1bf   :  { %v253_v6 = vpop.f32.mrb[2].mxu0 }
 0x1c0   :  { %v256_v7 = vmax.f32 %v251_v4, 0.0  ;;  %v392_v8 = vpop.f32.mrb[3].mxu0 }
 0x1c2   :  { %v257_v9 = vpack.c.bf16 %v256_v7, %v256_v7 }
 0x1c4   :  { %402 = vmatmul.mubr.msk.bf16.vlgmr.msra.gmra.mrb[0].mxu1 %vm212_vm1, %v257_v9 }
 0x297   :  { %v334_v10 = vpop.f32.mrb[0].mxu1 }
 0x298   :  { %v335_v12 = vadd.f32 %v365_v11, %v334_v10  ;;  %v403_v13 = vpop.f32.mrb[1].mxu1 }
 0x299   :  { %v337_v14 = vpop.f32.mrb[2].mxu1 }
 0x29a   :  { %340 = vst [vmem:[#allocation10] sm:$0xff] %v335_v12  ;;  %v404_v15 = vpop.f32.mrb[3].mxu1 }
 0x29b   :  { %538 = shalt.err (!%p535_p8)
}
 0x29c   :  { %s539_s6 = scalar_lea.hbm %s702_s7, 128 }
 0x29d   :  { %p540_p9 = scmp.ne.s32.totalorder %s702_s7, %s539_s6  ;;  %p543_p10 = scmp.lt.u32.totalorder %s539_s6, %s702_s7 }
 0x29f   :  { %p545_p11 = pnand %p543_p10, %p540_p9 }
 0x2a1   :  { %548 = shalt.err (!%p545_p11)
}
 0x2a2   :  { %350 = dma.vmem_to_hbm [thread:$0]  %s348_s30, 128, %s702_s7, [#allocation4]  }
 0x2a3   :  { %555 = dma.done.wait [#allocation4], 128  }
 0x2a4   :  { %556 = vsyncadd [#allocation4], 4294967168 }
 0x2a5   :  { %354 = vsyncpa [#allocation3], 1 }
 0x2a6   :  { %355 = vsyncpa [#allocation6], 1 }
 0x2a7   :  { %356 = vsyncpa [#allocation9], 1 }
 0x2a8   :  { %357 = vsyncpa [#allocation4], 1 }

</bundles_post_ra>
